<compile_context>
chip_gen: v6e
topology: v6e:2x2x1
jax: 0.10.0
libtpu: 0.0.40
codegen_flags: <defaults>
</compile_context>

<pallas_src>
import numpy as np
import jax
import jax.numpy as jnp
from jax.experimental import pallas as pl
from jax.experimental.pallas import tpu as pltpu

BN_EPS = 1e-5


# ----------------------------------------------------------------------------
# Plain-JAX ResNet50 backbone (glue), NHWC layout.
# TODO(synk): the 53-conv ResNet50 backbone stays in plain JAX; only the CAM
# head (classifier 1x1 conv + ReLU) is lowered to a Pallas kernel.
# ----------------------------------------------------------------------------
def _bn(x):
    # eval-mode BatchNorm2d with default-initialized params/stats:
    # gamma=1, beta=0, running_mean=0, running_var=1.
    return x * (1.0 / np.sqrt(1.0 + BN_EPS))


def _conv(x, w, stride=1, padding=0, dilation=1):
    # x: NHWC, w: HWIO (keeps channels on the lane axis end-to-end).
    return jax.lax.conv_general_dilated(
        x, w,
        window_strides=(stride, stride),
        padding=[(padding, padding), (padding, padding)],
        rhs_dilation=(dilation, dilation),
        dimension_numbers=("NHWC", "HWIO", "NHWC"))


def _maxpool3x3s2(x):
    return jax.lax.reduce_window(
        x, -jnp.inf, jax.lax.max,
        window_dimensions=(1, 3, 3, 1),
        window_strides=(1, 2, 2, 1),
        padding=[(0, 0), (1, 1), (1, 1), (0, 0)])


def _make_params(key, out_dim=2):
    keys = iter(jax.random.split(key, 128))

    def conv_w(out_c, in_c, k):
        fan_in = in_c * k * k
        return (jax.random.normal(next(keys), (k, k, in_c, out_c), jnp.float32)
                * np.sqrt(2.0 / fan_in))

    params = {"conv1": conv_w(64, 3, 7)}
    inplanes = 64
    # strides=(2, 2, 2, 1): conv1 stride 2, layer strides (1, 2, 2, 1)
    layer_cfg = [(64, 3, 1), (128, 4, 2), (256, 6, 2), (512, 3, 1)]
    for li, (planes, blocks, stride) in enumerate(layer_cfg, start=1):
        blocks_p = []
        for b in range(blocks):
            s = stride if b == 0 else 1
            p = {"conv1": conv_w(planes, inplanes, 1),
                 "conv2": conv_w(planes, planes, 3),
                 "conv3": conv_w(planes * 4, planes, 1),
                 "stride": s}
            if b == 0 and (stride != 1 or inplanes != planes * 4):
                p["down"] = conv_w(planes * 4, inplanes, 1)
            blocks_p.append(p)
            inplanes = planes * 4
        params[f"layer{li}"] = blocks_p
    # classifier: nn.Conv2d(2048, out_dim, 1, bias=False).weight[:, :, 0, 0]
    params["classifier"] = (
        jax.random.normal(next(keys), (out_dim, 2048), jnp.float32)
        * np.sqrt(2.0 / 2048))
    return params


def _bottleneck(x, p, dilation=1):
    s = p["stride"]
    out = jax.nn.relu(_bn(_conv(x, p["conv1"])))
    out = jax.nn.relu(_bn(_conv(out, p["conv2"], stride=s,
                                padding=dilation, dilation=dilation)))
    out = _bn(_conv(out, p["conv3"]))
    identity = x
    if "down" in p:
        identity = _bn(_conv(x, p["down"], stride=s))
    return jax.nn.relu(out + identity)


def _backbone(x, params):
    # stage1: conv1 + bn1 + relu + maxpool + layer1 (NHWC throughout)
    x = jax.nn.relu(_bn(_conv(x, params["conv1"], stride=2, padding=3)))
    x = _maxpool3x3s2(x)
    for p in params["layer1"]:
        x = _bottleneck(x, p)
    for p in params["layer2"]:   # stage2
        x = _bottleneck(x, p)
    for p in params["layer3"]:   # stage3
        x = _bottleneck(x, p)
    for p in params["layer4"]:   # stage4
        x = _bottleneck(x, p)
    # bf16 epilogue: the Pallas head reads lane-dense bf16 straight from HBM.
    return x.astype(jnp.bfloat16)  # (B, H/16, W/16, 2048)


# ----------------------------------------------------------------------------
# Pallas CAM head kernel: 1x1 classifier conv (MXU) + ReLU, per image, with a
# lane-dense (B, K, HW-tile) output.  Flip-add of the logits happens outside.
# ----------------------------------------------------------------------------
def _cam_head_kernel(feat_ref, w_ref, out_ref):
    # feat_ref: (B, T, C) bf16   w_ref: (K, C) bf16   out_ref: (B, K, T) f32
    w = w_ref[...]
    for b in range(feat_ref.shape[0]):           # B == 2, static unroll
        # (K, C) contracted with (T, C) on C -> (K, T): the HW tile stays on
        # the 128-lane axis, so the f32 store below is unmasked (lane-dense).
        s = jax.lax.dot_general(
            w, feat_ref[b],
            dimension_numbers=(((1,), (1,)), ((), ())),
            preferred_element_type=jnp.float32)
        out_ref[b] = jnp.maximum(s, 0.0)         # ReLU in f32 (v5e-safe)


def _round_up(x, m):
    return ((x + m - 1) // m) * m


def _vmem_capacity_bytes():
    try:
        return int(pltpu.get_tpu_info().vmem_capacity_bytes)
    except Exception:
        return 64 * 1024 * 1024                  # conservative (v7x-sized)


def _head_tiling(hw):
    vmem = _vmem_capacity_bytes()
    if vmem >= 100 * 1024 * 1024:
        # v5e / v6e: 128 MiB physical VMEM -> big streaming tiles.
        max_tile, vmem_limit, want_two_steps = 2048, 64 * 1024 * 1024, False
    else:
        # v7x: 64 MiB VMEM but 2 TensorCores -> cap the tile and make sure the
        # "parallel" grid axis has >= 2 steps so both cores get work.
        max_tile, vmem_limit, want_two_steps = 1024, 40 * 1024 * 1024, True
    if hw <= max_tile:
        tile = hw                                    # single full-extent block
        if want_two_steps and hw >= 256:
            tile = _round_up(pl.cdiv(hw, 2), 128)    # >=2 steps, 128-aligned
    else:
        tile = max_tile                              # multiple of 128 (bf16-pack ok)
    return tile, vmem_limit


def cam_head(feat_nhwc, clf_w):
    """CAM head: relu(conv1x1(x)) in Pallas, then x[0] + x[1].flip(W).

    feat_nhwc: (2, H, W, C) bf16 backbone features.
    clf_w:     (K, C) f32 classifier weight (Conv2d(C, K, 1).weight squeezed).
    returns:   (K, H, W) f32.
    """
    B, H, W, C = feat_nhwc.shape
    assert B == 2, "CAM.forward uses x[0] + x[1].flip(-1); batch must be 2"
    K = clf_w.shape[0]
    HW = H * W

    feat = feat_nhwc.reshape(B, HW, C)       # contiguous collapse, no relayout
    w = clf_w.astype(jnp.bfloat16)           # (K, C), C on the lane axis

    tile, vmem_limit = _head_tiling(HW)
    grid = (pl.cdiv(HW, tile),)              # ragged last block handled by Pallas

    cost = pl.CostEstimate(
        flops=2 * B * HW * C * K,
        transcendentals=0,
        bytes_accessed=B * HW * C * 2 + K * C * 2 + B * K * HW * 4)

    # TODO(synk): on v7x, pipeline_mode=pl.Buffered(3) on the feature spec can
    # further hide DMA issue latency once per-step blocks shrink to ~us scale.
    logits = pl.pallas_call(
        _cam_head_kernel,
        out_shape=jax.ShapeDtypeStruct((B, K, HW), jnp.float32),
        grid=grid,
        in_specs=[pl.BlockSpec((B, tile, C), lambda i: (0, i, 0)),
                  pl.BlockSpec((K, C), lambda i: (0, 0))],
        out_specs=pl.BlockSpec((B, K, tile), lambda i: (0, 0, i)),
        compiler_params=pltpu.CompilerParams(
            dimension_semantics=("parallel",),
            vmem_limit_bytes=vmem_limit),
        cost_estimate=cost,
    )(feat, w)

    # Flip-add on the tiny (K, H, W) logits (C/K = 1024x smaller than the
    # features), matching relu(conv(x))[0] + relu(conv(x))[1].flip(-1).
    logits = logits.reshape(B, K, H, W)
    return logits[0] + logits[1][:, :, ::-1]


if __name__ == "__main__":
    out_dim = 2
    key = jax.random.PRNGKey(0)
    pkey, xkey = jax.random.split(key)
    params = _make_params(pkey, out_dim=out_dim)

    # NCHW input (matches the PyTorch module); batch must be 2. 64x64 -> 4x4.
    x = jax.random.normal(xkey, (2, 3, 64, 64), jnp.float32)

    @jax.jit
    def forward(inp):
        feat = _backbone(jnp.transpose(inp, (0, 2, 3, 1)), params)  # NHWC bf16
        return cam_head(feat, params["classifier"]), feat

    result, feat = forward(x)
    result = jax.block_until_ready(result)

    # Plain-JAX/numpy reference for the head, using the same bf16-rounded
    # inputs the kernel sees (bf16 products are exact; only accumulation order
    # differs), so tolerances stay tight.
    feat_r = np.asarray(feat.astype(jnp.float32), dtype=np.float64)  # (B,H,W,C)
    w_r = np.asarray(
        params["classifier"].astype(jnp.bfloat16).astype(jnp.float32),
        dtype=np.float64)                                            # (K, C)
    logits_ref = np.einsum("bhwc,kc->bkhw", feat_r, w_r)
    logits_ref = np.maximum(logits_ref, 0.0)
    ref = logits_ref[0] + logits_ref[1][:, :, ::-1]

    assert result.shape == (out_dim, feat.shape[1], feat.shape[2])
    scale = float(np.max(np.abs(ref))) + 1e-6
    np.testing.assert_allclose(np.asarray(result), ref,
                               rtol=1e-3, atol=1e-3 * scale)
    print("KERNEL_OK")
</pallas_src>

<mosaic_0001>
module attributes {stable_mosaic.version = 11 : i64} {
  func.func @_cam_head_kernel(%arg0: i32, %arg1: memref<2x16x2048xbf16, #tpu.memory_space<vmem>>, %arg2: memref<2x2048xbf16, #tpu.memory_space<vmem>>, %arg3: memref<2x2x16xf32, #tpu.memory_space<vmem>>) attributes {dimension_semantics = [#tpu.dimension_semantics<parallel>], iteration_bounds = array<i64: 1>, scalar_prefetch = 0 : i64, scratch_operands = 0 : i64, tpu.core_type = #tpu.core_type<tc>, window_params = [{transform_indices = @transform_0, window_bounds = array<i64: 2, 16, 2048>}, {pipeline_mode = #tpu.pipeline_mode<synchronous>, transform_indices = @transform_1, window_bounds = array<i64: 2, 2048>}, {transform_indices = @transform_2, window_bounds = array<i64: 2, 2, 16>}]} {
    %c0 = arith.constant 0 : index
    %c0_0 = arith.constant 0 : index
    %0 = vector.load %arg2[%c0, %c0_0] : memref<2x2048xbf16, #tpu.memory_space<vmem>>, vector<2x2048xbf16>
    %c0_1 = arith.constant 0 : index
    %c0_2 = arith.constant 0 : index
    %c0_3 = arith.constant 0 : index
    %1 = vector.load %arg1[%c0_1, %c0_2, %c0_3] : memref<2x16x2048xbf16, #tpu.memory_space<vmem>>, vector<1x16x2048xbf16>
    %2 = vector.shape_cast %1 : vector<1x16x2048xbf16> to vector<16x2048xbf16>
    %cst = arith.constant dense<0.000000e+00> : vector<2x16xf32>
    %3 = tpu.matmul %0, %2, %cst {dimension_numbers = #tpu.dot_dimension_numbers<[1], [1], [0], [0], [0, 0, 1, 0], [], []>} : vector<2x2048xbf16>, vector<16x2048xbf16>, vector<2x16xf32> -> vector<2x16xf32>
    %cst_4 = arith.constant 0.000000e+00 : f32
    %4 = vector.broadcast %cst_4 : f32 to vector<2x16xf32>
    %5 = arith.maximumf %3, %4 : vector<2x16xf32>
    %c0_5 = arith.constant 0 : index
    %c0_6 = arith.constant 0 : index
    %c0_7 = arith.constant 0 : index
    %6 = vector.load %arg3[%c0_5, %c0_6, %c0_7] : memref<2x2x16xf32, #tpu.memory_space<vmem>>, vector<1x2x16xf32>
    %7 = vector.shape_cast %6 : vector<1x2x16xf32> to vector<2x16xf32>
    %8 = vector.shape_cast %5 : vector<2x16xf32> to vector<1x2x16xf32>
    tpu.vector_store %arg3[%c0_5, %c0_6, %c0_7], %8 {strides = array<i32>} : memref<2x2x16xf32, #tpu.memory_space<vmem>>, vector<1x2x16xf32>,
    %c1 = arith.constant 1 : index
    %c0_8 = arith.constant 0 : index
    %c0_9 = arith.constant 0 : index
    %9 = vector.load %arg1[%c1, %c0_8, %c0_9] : memref<2x16x2048xbf16, #tpu.memory_space<vmem>>, vector<1x16x2048xbf16>
    %10 = vector.shape_cast %9 : vector<1x16x2048xbf16> to vector<16x2048xbf16>
    %cst_10 = arith.constant dense<0.000000e+00> : vector<2x16xf32>
    %11 = tpu.matmul %0, %10, %cst_10 {dimension_numbers = #tpu.dot_dimension_numbers<[1], [1], [0], [0], [0, 0, 1, 0], [], []>} : vector<2x2048xbf16>, vector<16x2048xbf16>, vector<2x16xf32> -> vector<2x16xf32>
    %cst_11 = arith.constant 0.000000e+00 : f32
    %12 = vector.broadcast %cst_11 : f32 to vector<2x16xf32>
    %13 = arith.maximumf %11, %12 : vector<2x16xf32>
    %c1_12 = arith.constant 1 : index
    %c0_13 = arith.constant 0 : index
    %c0_14 = arith.constant 0 : index
    %14 = vector.load %arg3[%c1_12, %c0_13, %c0_14] : memref<2x2x16xf32, #tpu.memory_space<vmem>>, vector<1x2x16xf32>
    %15 = vector.shape_cast %14 : vector<1x2x16xf32> to vector<2x16xf32>
    %16 = vector.shape_cast %13 : vector<2x16xf32> to vector<1x2x16xf32>
    tpu.vector_store %arg3[%c1_12, %c0_13, %c0_14], %16 {strides = array<i32>} : memref<2x2x16xf32, #tpu.memory_space<vmem>>, vector<1x2x16xf32>,
    return
  }
  func.func @transform_0(%arg0: i32) -> (i32, i32, i32) {
    %c0_i32 = arith.constant 0 : i32
    %c0_i32_0 = arith.constant 0 : i32
    %c0_i32_1 = arith.constant 0 : i32
    return %c0_i32, %arg0, %c0_i32_0 : i32, i32, i32
  }
  func.func @transform_1(%arg0: i32) -> (i32, i32) {
    %c0_i32 = arith.constant 0 : i32
    %c0_i32_0 = arith.constant 0 : i32
    %c0_i32_1 = arith.constant 0 : i32
    return %c0_i32, %c0_i32_0 : i32, i32
  }
  func.func @transform_2(%arg0: i32) -> (i32, i32, i32) {
    %c0_i32 = arith.constant 0 : i32
    %c0_i32_0 = arith.constant 0 : i32
    %c0_i32_1 = arith.constant 0 : i32
    return %c0_i32, %c0_i32_0, %arg0 : i32, i32, i32
  }
}

</mosaic_0001>

<bundles_post_ra>
// kernel: forward.1
= control target key start
LH: loop header
LB: loop body
LE: loop exit
PB: predicated region body
PF: predicated region fallthrough
CT: control target
= control target key end

     0   :  { %v36_v0 = vlaneseq  ;;  %v1025_v4 = vmov 1966171168   ;;  %vm547_vm0 = vcmask 123904   ;;  %s1235_s0 = inlined_call_operand.vmem [shape: bf16[2,16,2048], index: 0, kind: input, shape index: {}]   ;;  %s1236_s1 = inlined_call_operand.vmem [shape: bf16[2,2048], index: 1, kind: input, shape index: {}]   ;;  %s1237_s2 = inlined_call_operand.vmem [shape: f32[2,2,16], index: 2, kind: output, shape index: {}]  }
   0x1   :  { %v14_v1 = vld [vmem:[%s1235_s0] sm:$0xff]  ;;  %v15_v3 = vld [vmem:[%s1235_s0 + $0x8] sm:$0xff]  ;;  %v34_v5 = vunpack.c.l.s4 %v1025_v4  ;;  %v16_v11 = vld [vmem:[%s1235_s0 + $0x10] sm:$0xff] }
   0x2   :  { %v22_v2 = vld [vmem:[%s1235_s0 + $0x40] sm:$0xff]  ;;  %v23_v8 = vld [vmem:[%s1235_s0 + $0x48] sm:$0xff]  ;;  %v37_v10 = vshrl.u32 %v36_v0, 7  ;;  %v24_v15 = vld [vmem:[%s1235_s0 + $0x50] sm:$0xff] }
   0x3   :  { %v974_v6 = vcombine.high %v14_v1, %v22_v2  ;;  %v973_v7 = vcombine.low %v14_v1, %v22_v2  ;;  %v12_v9 = vld [vmem:[%s1236_s1] sm:$0xff]  ;;  %v976_v12 = vcombine.high %v15_v3, %v23_v8  ;;  %v975_v13 = vcombine.low %v15_v3, %v23_v8  ;;  %v17_v16 = vld [vmem:[%s1235_s0 + $0x18] sm:$0xff]  ;;  %v13_v22 = vld [vmem:[%s1236_s1 + $0x8] sm:$0xff] }
   0x4   :  { %v35_v14 = vunpack.c.0.s8 %v34_v5  ;;  %v25_v17 = vld [vmem:[%s1235_s0 + $0x58] sm:$0xff]  ;;  %v32_v18 = vcombine.high %v12_v9, %v12_v9  ;;  %v978_v19 = vcombine.high %v16_v11, %v24_v15  ;;  %v18_v29 = vld [vmem:[%s1235_s0 + $0x20] sm:$0xff]  ;;  %v977_v32 = vcombine.low %v16_v11, %v24_v15  ;;  %v19_v34 = vld [vmem:[%s1235_s0 + $0x28] sm:$0xff] }
   0x5   :  { %240 = vmatprep.subr.bf16.mxu0 %v974_v6  ;;  %v980_v20 = vcombine.high %v17_v16, %v25_v17  ;;  %280 = vmatprep.subr.bf16.mxu1 %v976_v12  ;;  %v26_v30 = vld [vmem:[%s1235_s0 + $0x60] sm:$0xff]  ;;  %v27_v35 = vld [vmem:[%s1235_s0 + $0x68] sm:$0xff]  ;;  %v979_v36 = vcombine.low %v17_v16, %v25_v17  ;;  %v81_v41 = vcombine.high %v13_v22, %v13_v22  ;;  %v20_v46 = vld [vmem:[%s1235_s0 + $0x30] sm:$0xff] }
   0x6   :  { %241 = vmatpush1.bf16.xpose.msra.mxu0 %v973_v7  ;;  %v1068_v21 = vsub.s32 %v35_v14, %v37_v10  ;;  %281 = vmatpush1.bf16.xpose.msra.mxu1 %v975_v13  ;;  %v982_v39 = vcombine.high %v18_v29, %v26_v30  ;;  %v984_v43 = vcombine.high %v19_v34, %v27_v35  ;;  %v28_v47 = vld [vmem:[%s1235_s0 + $0x70] sm:$0xff]  ;;  %v21_v50 = vld [vmem:[%s1235_s0 + $0x38] sm:$0xff]  ;;  %v989_v60 = vld [vmem:[%s1235_s0 + $0x80] sm:$0xff] }
   0x7   :  { %320 = vmatprep.subr.bf16.mxu0 %v978_v19  ;;  %360 = vmatprep.subr.bf16.mxu1 %v980_v20  ;;  %v981_v49 = vcombine.low %v18_v29, %v26_v30  ;;  %v29_v51 = vld [vmem:[%s1235_s0 + $0x78] sm:$0xff]  ;;  %v986_v53 = vcombine.high %v20_v46, %v28_v47  ;;  %v983_v54 = vcombine.low %v19_v34, %v27_v35  ;;  %v997_v61 = vld [vmem:[%s1235_s0 + $0xc0] sm:$0xff]  ;;  %v990_v63 = vld [vmem:[%s1235_s0 + $0x88] sm:$0xff] }
   0x8   :  { %v39_v23 = vrot.slane %v12_v9, %v1068_v21  ;;  %v46_v24 = vrot.slane %v32_v18, %v1068_v21  ;;  %v88_v28 = vrot.slane %v13_v22, %v1068_v21  ;;  %v95_v48 = vrot.slane %v81_v41, %v1068_v21  ;;  %v998_v0 = vld [vmem:[%s1235_s0 + $0xc8] sm:$0xff]  ;;  %v991_v7 = vld [vmem:[%s1235_s0 + $0x90] sm:$0xff]  ;;  %v992_v10 = vld [vmem:[%s1235_s0 + $0x98] sm:$0xff] }
   0x9   :  { %v988_v57 = vcombine.high %v21_v50, %v29_v51  ;;  %v985_v62 = vcombine.low %v20_v46, %v28_v47  ;;  %v1006_v2 = vcombine.high %v989_v60, %v997_v61  ;;  %v987_v3 = vcombine.low %v21_v50, %v29_v51  ;;  %v999_v8 = vld [vmem:[%s1235_s0 + $0xd0] sm:$0xff]  ;;  %v1000_v11 = vld [vmem:[%s1235_s0 + $0xd8] sm:$0xff]  ;;  %v993_v16 = vld [vmem:[%s1235_s0 + $0xa0] sm:$0xff] }
   0xa   :  { %v47_v25 = vcombine.high %v39_v23, %v39_v23  ;;  %v1076_v26 = vrot.slane %v39_v23, %v1068_v21  ;;  %v48_v27 = vcombine.high %v46_v24, %v46_v24  ;;  %v96_v40 = vcombine.high %v88_v28, %v88_v28  ;;  %v1001_v17 = vld [vmem:[%s1235_s0 + $0xe0] sm:$0xff]  ;;  %v994_v19 = vld [vmem:[%s1235_s0 + $0xa8] sm:$0xff] }
   0xb   :  { %v1115_v44 = vrot.slane %v46_v24, %v1068_v21  ;;  %v97_v56 = vcombine.high %v95_v48, %v95_v48  ;;  %v1146_v58 = vrot.slane %v88_v28, %v1068_v21  ;;  %v1008_v5 = vcombine.high %v990_v63, %v998_v0  ;;  %v1002_v20 = vld [vmem:[%s1235_s0 + $0xe8] sm:$0xff]  ;;  %v995_v24 = vld [vmem:[%s1235_s0 + $0xb0] sm:$0xff]  ;;  %v1004_v28 = vld [vmem:[%s1235_s0 + $0xf8] sm:$0xff] }
   0xc   :  { %v1086_v31 = vrot.slane %v47_v25, %v1068_v21  ;;  %v1089_v33 = vrot.slane %v48_v27, %v1068_v21  ;;  %v1099_v37 = vcombine.high %v1076_v26, %v1076_v26  ;;  %v1118_v45 = vrot.slane %v96_v40, %v1068_v21  ;;  %v1003_v25 = vld [vmem:[%s1235_s0 + $0xf0] sm:$0xff]  ;;  %v996_v27 = vld [vmem:[%s1235_s0 + $0xb8] sm:$0xff] }
   0xd   :  { %v1136_v52 = vcombine.high %v1115_v44, %v1115_v44  ;;  %v1150_v59 = vrot.slane %v97_v56, %v1068_v21  ;;  %v1166_v1 = vcombine.high %v1146_v58, %v1146_v58  ;;  %v111_v6 = vrot.slane %v95_v48, %v1068_v21 }
   0xe   :  { %258 = vmatprep.mubr.bf16.mxu0 %v1086_v31  ;;  %v1104_v38 = vcombine.high %v1086_v31, %v1086_v31  ;;  %v1109_v42 = vcombine.high %v1089_v33, %v1089_v33  ;;  %v1140_v55 = vcombine.high %v1118_v45, %v1118_v45  ;;  %v1005_v9 = vcombine.low %v989_v60, %v997_v61 }
   0xf   :  { %259 = vmatmul.mubr.bf16.vlgmr.msra.gmra.mxu0 %v1076_v26  ;;  %v1170_v4 = vcombine.high %v1150_v59, %v1150_v59  ;;  %v127_v12 = vcombine.high %v111_v6, %v111_v6  ;;  %v1010_v13 = vcombine.high %v991_v7, %v999_v8  ;;  %v1007_v14 = vcombine.low %v990_v63, %v998_v0 }
  0x10   :  { %298 = vmatprep.mubr.bf16.mxu1 %v1104_v38  ;;  %321 = vmatpush1.bf16.xpose.msra.mxu0 %v977_v32  ;;  %v1012_v15 = vcombine.high %v992_v10, %v1000_v11  ;;  %v1009_v18 = vcombine.low %v991_v7, %v999_v8  ;;  %v1014_v21 = vcombine.high %v993_v16, %v1001_v17 }
  0x11   :  { %299 = vmatmul.mubr.bf16.vlgmr.msra.gmra.mxu1 %v1099_v37  ;;  %338 = vmatprep.mubr.bf16.mxu0 %v1089_v33  ;;  %v1011_v22 = vcombine.low %v992_v10, %v1000_v11  ;;  %v1016_v23 = vcombine.high %v994_v19, %v1002_v20  ;;  %v1018_v29 = vcombine.high %v995_v24, %v1003_v25 }
  0x12   :  { %361 = vmatpush1.bf16.xpose.msra.mxu1 %v979_v36  ;;  %400 = vmatprep.subr.bf16.mxu0 %v982_v39  ;;  %v1015_v30 = vcombine.low %v994_v19, %v1002_v20  ;;  %v1017_v32 = vcombine.low %v995_v24, %v1003_v25 }
  0x13   :  { %378 = vmatprep.mubr.bf16.mxu1 %v1109_v42  ;;  %440 = vmatprep.subr.bf16.mxu1 %v984_v43 }
  0x17   :  { %339 = vmatmul.mubr.bf16.vlgmr.msra.gmra.mxu0 %v1115_v44 }
  0x18   :  { %401 = vmatpush1.bf16.xpose.msra.mxu0 %v981_v49  ;;  %418 = vmatprep.mubr.bf16.mxu0 %v1118_v45 }
  0x19   :  { %379 = vmatmul.mubr.bf16.vlgmr.msra.gmra.mxu1 %v1136_v52  ;;  %480 = vmatprep.subr.bf16.mxu0 %v986_v53 }
  0x1a   :  { %441 = vmatpush1.bf16.xpose.msra.mxu1 %v983_v54  ;;  %458 = vmatprep.mubr.bf16.mxu1 %v1140_v55 }
  0x1b   :  { %520 = vmatprep.subr.bf16.mxu1 %v988_v57 }
  0x1f   :  { %419 = vmatmul.mubr.bf16.vlgmr.msra.gmra.mxu0 %v1146_v58 }
  0x20   :  { %481 = vmatpush1.bf16.xpose.msra.mxu0 %v985_v62  ;;  %498 = vmatprep.mubr.bf16.mxu0 %v1150_v59 }
  0x21   :  { %459 = vmatmul.mubr.bf16.vlgmr.msra.gmra.mxu1 %v1166_v1  ;;  %660 = vmatprep.subr.bf16.mxu0 %v1006_v2 }
  0x22   :  { %521 = vmatpush1.bf16.xpose.msra.mxu1 %v987_v3  ;;  %538 = vmatprep.mubr.bf16.mxu1 %v1170_v4 }
  0x23   :  { %700 = vmatprep.subr.bf16.mxu1 %v1008_v5 }
  0x27   :  { %499 = vmatmul.mubr.bf16.vlgmr.msra.gmra.mxu0 %v111_v6 }
  0x28   :  { %661 = vmatpush1.bf16.xpose.msra.mxu0 %v1005_v9  ;;  %678 = vmatprep.mubr.bf16.mxu0 %v1086_v31  ;;  %v1020_v31 = vcombine.high %v996_v27, %v1004_v28 }
  0x29   :  { %539 = vmatmul.mubr.bf16.vlgmr.msra.gmra.mxu1 %v127_v12  ;;  %740 = vmatprep.subr.bf16.mxu0 %v1010_v13 }
  0x2a   :  { %701 = vmatpush1.bf16.xpose.msra.mxu1 %v1007_v14  ;;  %718 = vmatprep.mubr.bf16.mxu1 %v1104_v38 }
  0x2b   :  { %780 = vmatprep.subr.bf16.mxu1 %v1012_v15 }
  0x2f   :  { %679 = vmatmul.mubr.bf16.vlgmr.msra.gmra.mxu0 %v1076_v26  ;;  %v1013_v26 = vcombine.low %v993_v16, %v1001_v17 }
  0x30   :  { %741 = vmatpush1.bf16.xpose.msra.mxu0 %v1009_v18  ;;  %758 = vmatprep.mubr.bf16.mxu0 %v1089_v33  ;;  %v1019_v33 = vcombine.low %v996_v27, %v1004_v28 }
  0x31   :  { %719 = vmatmul.mubr.bf16.vlgmr.msra.gmra.mxu1 %v1099_v37  ;;  %820 = vmatprep.subr.bf16.mxu0 %v1014_v21 }
  0x32   :  { %781 = vmatpush1.bf16.xpose.msra.mxu1 %v1011_v22  ;;  %798 = vmatprep.mubr.bf16.mxu1 %v1109_v42 }
  0x33   :  { %860 = vmatprep.subr.bf16.mxu1 %v1016_v23 }
  0x37   :  { %759 = vmatmul.mubr.bf16.vlgmr.msra.gmra.mxu0 %v1115_v44 }
  0x38   :  { %821 = vmatpush1.bf16.xpose.msra.mxu0 %v1013_v26  ;;  %838 = vmatprep.mubr.bf16.mxu0 %v1118_v45 }
  0x39   :  { %799 = vmatmul.mubr.bf16.vlgmr.msra.gmra.mxu1 %v1136_v52  ;;  %900 = vmatprep.subr.bf16.mxu0 %v1018_v29 }
  0x3a   :  { %861 = vmatpush1.bf16.xpose.msra.mxu1 %v1015_v30  ;;  %878 = vmatprep.mubr.bf16.mxu1 %v1140_v55 }
  0x3b   :  { %940 = vmatprep.subr.bf16.mxu1 %v1020_v31 }
  0x3f   :  { %839 = vmatmul.mubr.bf16.vlgmr.msra.gmra.mxu0 %v1146_v58 }
  0x40   :  { %901 = vmatpush1.bf16.xpose.msra.mxu0 %v1017_v32  ;;  %918 = vmatprep.mubr.bf16.mxu0 %v1150_v59 }
  0x41   :  { %879 = vmatmul.mubr.bf16.vlgmr.msra.gmra.mxu1 %v1166_v1 }
  0x42   :  { %941 = vmatpush1.bf16.xpose.msra.mxu1 %v1019_v33  ;;  %958 = vmatprep.mubr.bf16.mxu1 %v1170_v4 }
  0x47   :  { %919 = vmatmul.mubr.bf16.vlgmr.msra.gmra.mxu0 %v111_v6 }
  0x49   :  { %959 = vmatmul.mubr.bf16.vlgmr.msra.gmra.mxu1 %v127_v12 }
  0xcf   :  { %v260_v34 = vpop.f32.mrf.mxu0 }
  0xd1   :  { %v262_v35 = vpop.f32.mrf.mxu0  ;;  %v300_v36 = vpop.f32.mrf.mxu1 }
  0xd2   :  { %v301_v45 = vadd.f32 %v300_v36, %v260_v34 }
  0xd3   :  { %v263_v37 = vpop.f32.mrf.mxu0  ;;  %v302_v38 = vpop.f32.mrf.mxu1 }
  0xd5   :  { %v264_v39 = vpop.f32.mrf.mxu0  ;;  %v303_v40 = vpop.f32.mrf.mxu1 }
  0xd7   :  { %v304_v41 = vpop.f32.mrf.mxu1  ;;  %v340_v42 = vpop.f32.mrf.mxu0 }
  0xd8   :  { %v341_v48 = vadd.f32 %v340_v42, %v301_v45 }
  0xd9   :  { %v342_v43 = vpop.f32.mrf.mxu0  ;;  %v380_v44 = vpop.f32.mrf.mxu1 }
  0xda   :  { %v381_v53 = vadd.f32 %v380_v44, %v341_v48 }
  0xdb   :  { %v343_v46 = vpop.f32.mrf.mxu0  ;;  %v382_v47 = vpop.f32.mrf.mxu1 }
  0xdd   :  { %v344_v49 = vpop.f32.mrf.mxu0  ;;  %v383_v50 = vpop.f32.mrf.mxu1 }
  0xdf   :  { %v384_v51 = vpop.f32.mrf.mxu1  ;;  %v420_v52 = vpop.f32.mrf.mxu0 }
  0xe0   :  { %v421_v56 = vadd.f32 %v420_v52, %v381_v53 }
  0xe1   :  { %v422_v54 = vpop.f32.mrf.mxu0  ;;  %v460_v55 = vpop.f32.mrf.mxu1 }
  0xe2   :  { %v461_v61 = vadd.f32 %v460_v55, %v421_v56 }
  0xe3   :  { %v423_v57 = vpop.f32.mrf.mxu0  ;;  %v462_v58 = vpop.f32.mrf.mxu1 }
  0xe5   :  { %v424_v59 = vpop.f32.mrf.mxu0  ;;  %v463_v60 = vpop.f32.mrf.mxu1 }
  0xe7   :  { %v464_v62 = vpop.f32.mrf.mxu1  ;;  %v500_v63 = vpop.f32.mrf.mxu0 }
  0xe8   :  { %v501_v0 = vadd.f32 %v500_v63, %v461_v61 }
  0xe9   :  { %v502_v1 = vpop.f32.mrf.mxu0  ;;  %v540_v2 = vpop.f32.mrf.mxu1 }
  0xea   :  { %v541_v3 = vadd.f32 %v540_v2, %v501_v0 }
  0xeb   :  { %v503_v4 = vpop.f32.mrf.mxu0  ;;  %v542_v5 = vpop.f32.mrf.mxu1 }
  0xec   :  { %v546_v6 = vmax.f32 %v541_v3, 0.0 }
  0xed   :  { %v504_v7 = vpop.f32.mrf.mxu0  ;;  %v543_v8 = vpop.f32.mrf.mxu1 }
  0xee   :  { %548 = vst.msk [vmem:[%s1237_s2] sm:$0x3] %vm547_vm0, %v546_v6 }
  0xef   :  { %v544_v9 = vpop.f32.mrf.mxu1  ;;  %v680_v10 = vpop.f32.mrf.mxu0 }
  0xf1   :  { %v682_v11 = vpop.f32.mrf.mxu0  ;;  %v720_v12 = vpop.f32.mrf.mxu1 }
  0xf2   :  { %v721_v21 = vadd.f32 %v720_v12, %v680_v10 }
  0xf3   :  { %v683_v13 = vpop.f32.mrf.mxu0  ;;  %v722_v14 = vpop.f32.mrf.mxu1 }
  0xf5   :  { %v684_v15 = vpop.f32.mrf.mxu0  ;;  %v723_v16 = vpop.f32.mrf.mxu1 }
  0xf7   :  { %v724_v17 = vpop.f32.mrf.mxu1  ;;  %v760_v18 = vpop.f32.mrf.mxu0 }
  0xf8   :  { %v761_v24 = vadd.f32 %v760_v18, %v721_v21 }
  0xf9   :  { %v762_v19 = vpop.f32.mrf.mxu0  ;;  %v800_v20 = vpop.f32.mrf.mxu1 }
  0xfa   :  { %v801_v29 = vadd.f32 %v800_v20, %v761_v24 }
  0xfb   :  { %v763_v22 = vpop.f32.mrf.mxu0  ;;  %v802_v23 = vpop.f32.mrf.mxu1 }
  0xfd   :  { %v764_v25 = vpop.f32.mrf.mxu0  ;;  %v803_v26 = vpop.f32.mrf.mxu1 }
  0xff   :  { %v804_v27 = vpop.f32.mrf.mxu1  ;;  %v840_v28 = vpop.f32.mrf.mxu0 }
 0x100   :  { %v841_v32 = vadd.f32 %v840_v28, %v801_v29 }
 0x101   :  { %v842_v30 = vpop.f32.mrf.mxu0  ;;  %v880_v31 = vpop.f32.mrf.mxu1 }
 0x102   :  { %v881_v37 = vadd.f32 %v880_v31, %v841_v32 }
 0x103   :  { %v843_v33 = vpop.f32.mrf.mxu0  ;;  %v882_v34 = vpop.f32.mrf.mxu1 }
 0x105   :  { %v844_v35 = vpop.f32.mrf.mxu0  ;;  %v883_v36 = vpop.f32.mrf.mxu1 }
 0x107   :  { %v884_v38 = vpop.f32.mrf.mxu1  ;;  %v920_v39 = vpop.f32.mrf.mxu0 }
 0x108   :  { %v921_v40 = vadd.f32 %v920_v39, %v881_v37 }
 0x109   :  { %v922_v41 = vpop.f32.mrf.mxu0  ;;  %v960_v42 = vpop.f32.mrf.mxu1 }
 0x10a   :  { %v961_v43 = vadd.f32 %v960_v42, %v921_v40 }
 0x10b   :  { %v923_v44 = vpop.f32.mrf.mxu0  ;;  %v962_v45 = vpop.f32.mrf.mxu1 }
 0x10c   :  { %v966_v46 = vmax.f32 %v961_v43, 0.0 }
 0x10d   :  { %v924_v47 = vpop.f32.mrf.mxu0  ;;  %v963_v48 = vpop.f32.mrf.mxu1 }
 0x10e   :  { %1021 = vst.msk [vmem:[%s1237_s2 + $0x2] sm:$0x3] %vm547_vm0, %v966_v46 }
 0x10f   :  { %v964_v49 = vpop.f32.mrf.mxu1 }

// kernel: squeeze.2
= control target key start
LH: loop header
LB: loop body
LE: loop exit
PB: predicated region body
PF: predicated region fallthrough
CT: control target
= control target key end

     0   :  { %s47_s8 = smov 116   ;;  %vm8_vm0 = vcmask 31744   ;;  %s48_s9 = smov 120   ;;  %s68_s0 = inlined_call_operand.vmem [shape: f32[1,2,16], index: 0, kind: input, shape index: {}]   ;;  %s69_s1 = inlined_call_operand.vmem [shape: f32[2,4,4], index: 1, kind: output, shape index: {}]  }
   0x1   :  { %v5_v0 = vld [vmem:[%s68_s0] sm:$0x3]  ;;  %s46_s0 = smov 124  }
   0x2   :  { %6 = vst [vmem:[#allocation1] sm:$0x3] %v5_v0 }
   0x9   :  { %v10_v1 = vld [vmem:[#allocation1] sm:$0x3]  }
   0xa   :  { %v22_v2 = vld [vmem:[#allocation1] sm:$0x3]   ;;  %11 = vrot.lane.b32.xlu0 %v10_v1, %s46_s0 }
   0xb   :  { %23 = vrot.lane.b32.xlu1 %v22_v2, %s47_s8  ;;  %v7_v3 = vld [vmem:[#allocation1] sm:$0x3]  }
   0xc   :  { %v16_v4 = vld [vmem:[#allocation1] sm:$0x3]   ;;  %9 = vst.msk [vmem:[#allocation0] ss:$8 sm:$0x3] %vm8_vm0, %v7_v3  }
   0xe   :  { %17 = vrot.lane.b32.xlu0 %v16_v4, %s48_s9 }
  0x7c   :  { %v12_v5 = vpop.permute.xlu0 %11  }
  0x7d   :  { %v24_v6 = vpop.permute.xlu1 %23   ;;  %15 = vst.msk [vmem:[#allocation0 + $0x1] ss:$8 sm:$0x3] %vm8_vm0, %v12_v5  }
  0x7e   :  { %27 = vst.msk [vmem:[#allocation0 + $0x3] ss:$8 sm:$0x3] %vm8_vm0, %v24_v6  }
  0x80   :  { %v18_v7 = vpop.permute.xlu0 %17  }
  0x81   :  { %21 = vst.msk [vmem:[#allocation0 + $0x2] ss:$8 sm:$0x3] %vm8_vm0, %v18_v7  }
  0x88   :  { %v32_v8 = vld [vmem:[#allocation0] sm:$0xf]  ;;  %v37_v9 = vld [vmem:[#allocation0 + $0x8] sm:$0xf] }
  0x89   :  { %35 = vst [vmem:[%s69_s1] sm:$0xf] %v32_v8  ;;  %42 = vst [vmem:[%s69_s1 + $0x4] sm:$0xf] %v37_v9 }

</bundles_post_ra>
